<compile_context>
chip_gen: v7x
topology: tpu7x:2x2x1
jax: 0.10.0
libtpu: 0.0.40
codegen_flags: <defaults>
</compile_context>

<pallas_src>
import functools

import jax
import jax.numpy as jnp
from jax.experimental import pallas as pl
from jax.experimental.pallas import tpu as pltpu

_LANE = 128
_VMEM_LIMIT_BYTES = 32 * 1024 * 1024      # explicit scoped-VMEM limit (safe v5e/v6e/v7x)
_TARGET_BLOCK_BYTES = 3 * 1024 * 1024     # ~2-4 MiB of input data per grid step
_MIN_BLOCK_BYTES = 256 * 1024             # don't shrink steps below this much data
_MAX_BLOCK_VMEM_BYTES = 12 * 1024 * 1024  # padded per-step footprint cap (<< limit)
_MIN_STEPS = 8                            # target grid length for large problems


def _round_up(v, m):
    return ((v + m - 1) // m) * m


def _round_down(v, m):
    return (v // m) * m


def _sublane_pack(itemsize):
    # Sublane packing of the dtype: 8 for f32, 16 for bf16, 32 for int8.
    return {4: 8, 2: 16, 1: 32}.get(itemsize, 8)


def _pool_kernel(x_ref, o_ref, *, layout, sz, w, wo, inv_window):
    """One row tile of pooling row groups.

    layout == "sum":  x_ref is (TG, sz*w) with w == sz  -> plain lane reduction.
    layout == "2d":   x_ref is (TG, sz*w), w % 128 == 0 -> lane-aligned slice pre-sum.
    layout == "3d":   x_ref is (TG, sz, w)              -> per-sublane-index pre-sum.
    o_ref: (TG, wo) output block.
    """
    if layout == "sum":
        xf = x_ref[...].astype(jnp.float32)
        y = jnp.sum(xf, axis=-1, keepdims=True)
    else:
        # Pre-sum the sz input rows of each group on the VPU so the MXU work stays
        # proportional to the bytes read.
        if layout == "2d":
            acc = x_ref[:, 0:w].astype(jnp.float32)
            for j in range(1, sz):
                acc = acc + x_ref[:, j * w:(j + 1) * w].astype(jnp.float32)
        else:  # "3d": avoids lane-unaligned slices when w % 128 != 0
            acc = x_ref[:, 0, :].astype(jnp.float32)
            for j in range(1, sz):
                acc = acc + x_ref[:, j, :].astype(jnp.float32)
        # 0/1 column-pooling matrix generated in-kernel from iota: no pmat input,
        # no extra DMA stream, no double-buffered VMEM for it.  Columns >= wo*sz
        # select nothing, which implements the floor-mode (ceil_mode=False) W-crop.
        col = jax.lax.broadcasted_iota(jnp.int32, (w, wo), 0)
        oc = jax.lax.broadcasted_iota(jnp.int32, (w, wo), 1)
        pmat = jnp.where((col >= oc * sz) & (col < oc * sz + sz),
                         1.0, 0.0).astype(jnp.float32)
        # HIGHEST precision keeps the f32 x {0,1} contraction exact; the MXU is
        # otherwise idle in this memory-bound kernel so the extra passes are free.
        y = jnp.dot(acc, pmat, preferred_element_type=jnp.float32,
                    precision=jax.lax.Precision.HIGHEST)
    o_ref[...] = (y * inv_window).astype(o_ref.dtype)


def _choose_row_tile(G, align, data_row_bytes, vmem_row_bytes, max_rows=None):
    """Pick TG (rows of row groups per grid step) and the grid length."""
    if G <= align:
        return G, 1
    data_row_bytes = max(int(data_row_bytes), 1)
    vmem_row_bytes = max(int(vmem_row_bytes), 1)

    g_cap = G
    if max_rows is not None:  # test hook: force smaller tiles / more grid steps
        g_cap = max(align, _round_down(min(int(max_rows), G), align))

    # Upper bound: ~3 MiB of input data per step, padded VMEM footprint bounded.
    cap = min(g_cap,
              _TARGET_BLOCK_BYTES // data_row_bytes,
              _MAX_BLOCK_VMEM_BYTES // vmem_row_bytes)
    cap = max(align, _round_down(cap, align))
    # Lower bound: don't shrink a step below ~256 KiB of data (per-step overhead).
    floor = max(align, _round_down(_MIN_BLOCK_BYTES // data_row_bytes, align))
    floor = min(floor, cap)

    tg = cap
    # Prefer >= _MIN_STEPS grid steps (DMA/compute overlap, and work for both v7x
    # TensorCores) as long as each step still moves >= _MIN_BLOCK_BYTES of data.
    tg_many = _round_down(G // _MIN_STEPS, align)
    if tg_many >= floor:
        tg = min(tg, tg_many)

    steps = pl.cdiv(G, tg)
    # Favor an even step count so the single "parallel" axis splits evenly across
    # v7x's two TensorCores.
    if steps > 1 and steps % 2 == 1:
        cand = tg - align
        stop = max(floor, tg - 16 * align)
        while cand >= stop:
            s = pl.cdiv(G, cand)
            if s % 2 == 0:
                tg, steps = cand, s
                break
            cand -= align
    return tg, steps


def compatible_avg_pool2d(x, sz, block_rows=None):
    """Equivalent of nn.AvgPool2d(kernel_size=sz, ceil_mode=False) on NCHW input."""
    N, C, H, W = x.shape
    sz = int(sz)
    assert sz >= 1
    if sz == 1:
        return x  # AvgPool2d(kernel_size=1, stride=1) is the identity

    Ho, Wo = H // sz, W // sz
    assert Ho >= 1 and Wo >= 1, "spatial dims smaller than the pooling kernel"

    # Floor-mode (ceil_mode=False) crops.  H needs a real crop when ragged; W only
    # when the whole row collapses to a single window (otherwise the W-crop is
    # folded into the in-kernel pooling matrix, costing no extra HBM pass).
    if Ho * sz != H:
        x = x[:, :, :Ho * sz, :]
    if Wo == 1 and W != sz:
        x = x[:, :, :, :sz]
        W = sz

    G = N * C * Ho                       # one row group per (n, c, output-row)
    itemsize = jnp.dtype(x.dtype).itemsize
    pack = _sublane_pack(itemsize)

    if Wo == 1:
        layout = "sum"                   # global reduction of the whole row group
    elif W % _LANE == 0:
        layout = "2d"                    # lane-aligned slices for the row pre-sum
    else:
        layout = "3d"                    # sublane-indexed pre-sum (no unaligned slices)

    # Per-row-group sizes used for tile selection (data vs lane/sublane-padded VMEM).
    if layout == "3d":
        rows = x.reshape(G, sz, W)       # contiguous -> free reshape, no copy
        in_row_vmem = _round_up(sz, pack) * _round_up(W, _LANE) * itemsize
        work_row = _round_up(W, _LANE) * 4
    else:
        rows = x.reshape(G, sz * W)      # contiguous -> free reshape, no copy
        in_row_vmem = _round_up(sz * W, _LANE) * itemsize
        work_row = _round_up(sz * W if layout == "sum" else W, _LANE) * 4
    out_row = _round_up(Wo, _LANE) * 4
    data_row = sz * W * itemsize
    vmem_row = 2 * in_row_vmem + work_row + 2 * out_row  # double-buffered in/out

    # NOTE: extremely large single row groups (e.g. global pool over >~600x600 f32
    # maps) would need a second reduction grid axis to fit VMEM; out of scope here.
    TG, steps = _choose_row_tile(G, pack, data_row, vmem_row, block_rows)

    if layout == "3d":
        in_spec = pl.BlockSpec((TG, sz, W), lambda i: (i, 0, 0))
    else:
        in_spec = pl.BlockSpec((TG, sz * W), lambda i: (i, 0))
    # Output block: Wo is the full minor dim, so its HBM writes are contiguous.
    out_spec = pl.BlockSpec((TG, Wo), lambda i: (i, 0))

    kernel = functools.partial(
        _pool_kernel, layout=layout, sz=sz, w=W, wo=Wo,
        inv_window=1.0 / float(sz * sz))

    flops = G * sz * W + (0 if layout == "sum" else 2 * G * W * Wo)
    cost = pl.CostEstimate(
        flops=flops,
        transcendentals=0,
        bytes_accessed=G * sz * W * itemsize + G * Wo * itemsize)

    # NOTE: for tiny problems (a few KiB, like the smoke tests below) a fused
    # jnp.mean would beat the pallas_call launch + DMA setup; kept on the Pallas
    # path so the kernel itself is exercised.
    out = pl.pallas_call(
        kernel,
        out_shape=jax.ShapeDtypeStruct((G, Wo), x.dtype),
        grid_spec=pltpu.PrefetchScalarGridSpec(
            num_scalar_prefetch=0,
            grid=(steps,),
            in_specs=[in_spec],
            out_specs=out_spec,
        ),
        compiler_params=pltpu.CompilerParams(
            dimension_semantics=("parallel",),
            vmem_limit_bytes=_VMEM_LIMIT_BYTES,
        ),
        cost_estimate=cost,
    )(rows)

    return out.reshape(N, C, Ho, Wo)


if __name__ == "__main__":
    key = jax.random.PRNGKey(0)

    pool = jax.jit(compatible_avg_pool2d, static_argnames=("sz", "block_rows"))

    def ref_pool(x, sz):
        n, c, h, w = x.shape
        ho, wo = h // sz, w // sz
        xc = x[:, :, :ho * sz, :wo * sz].reshape(n, c, ho, sz, wo, sz)
        return xc.astype(jnp.float32).mean(axis=(3, 5)).astype(x.dtype)

    cases = [
        ((2, 4, 16, 16), 16, None),    # true global average pool ("sum" path)
        ((2, 4, 16, 16), 4, None),     # regular pooling, W % 128 != 0 ("3d" pre-sum)
        ((2, 4, 16, 16), 3, None),     # ragged floor-mode crop of both H and W
        ((2, 4, 16, 16), 10, None),    # Wo == 1 with W > sz -> widened "sum" path
        ((2, 4, 128, 128), 2, None),   # W % 128 == 0 -> lane-aligned "2d" pre-sum
        ((2, 4, 16, 16), 2, 24),       # forced small tile -> multi-step ragged grid
        ((2, 4, 16, 16), 1, None),     # kernel_size=1 -> identity pass-through
    ]
    for shape, sz, block_rows in cases:
        key, sub = jax.random.split(key)
        x = jax.random.normal(sub, shape, dtype=jnp.float32)
        y = jax.block_until_ready(pool(x, sz=sz, block_rows=block_rows))
        r = ref_pool(x, sz)
        assert y.shape == r.shape, (sz, y.shape, r.shape)
        assert jnp.allclose(y, r, atol=1e-5, rtol=1e-5), \
            f"mismatch vs reference (shape={shape}, sz={sz})"

    print("KERNEL_OK")
</pallas_src>

<mosaic_0001>
module attributes {stable_mosaic.version = 11 : i64} {
  func.func @_pool_kernel(%arg0: i32, %arg1: memref<8x256xf32, #tpu.memory_space<vmem>>, %arg2: memref<8x1xf32, #tpu.memory_space<vmem>>) attributes {dimension_semantics = [#tpu.dimension_semantics<parallel>], iteration_bounds = array<i64: 1>, scalar_prefetch = 0 : i64, scratch_operands = 0 : i64, tpu.core_type = #tpu.core_type<tc>, window_params = [{transform_indices = @transform_0, window_bounds = array<i64: 8, 256>}, {transform_indices = @transform_1, window_bounds = array<i64: 8, 1>}]} {
    %c0 = arith.constant 0 : index
    %c0_0 = arith.constant 0 : index
    %0 = vector.load %arg1[%c0, %c0_0] : memref<8x256xf32, #tpu.memory_space<vmem>>, vector<8x256xf32>
    %cst = arith.constant dense<0.000000e+00> : vector<8xf32>
    %1 = vector.multi_reduction <add>, %0, %cst [1] : vector<8x256xf32> to vector<8xf32>
    %2 = vector.shape_cast %1 : vector<8xf32> to vector<8x1xf32>
    %cst_1 = arith.constant 3.906250e-03 : f32
    %3 = vector.broadcast %cst_1 : f32 to vector<8x1xf32>
    %4 = arith.mulf %2, %3 : vector<8x1xf32>
    %c0_2 = arith.constant 0 : index
    %c0_3 = arith.constant 0 : index
    %5 = vector.load %arg2[%c0_2, %c0_3] : memref<8x1xf32, #tpu.memory_space<vmem>>, vector<8x1xf32>
    tpu.vector_store %arg2[%c0_2, %c0_3], %4 {strides = array<i32>} : memref<8x1xf32, #tpu.memory_space<vmem>>, vector<8x1xf32>,
    return
  }
  func.func @transform_0(%arg0: i32) -> (i32, i32) {
    %c0_i32 = arith.constant 0 : i32
    %c0_i32_0 = arith.constant 0 : i32
    return %arg0, %c0_i32 : i32, i32
  }
  func.func @transform_1(%arg0: i32) -> (i32, i32) {
    %c0_i32 = arith.constant 0 : i32
    %c0_i32_0 = arith.constant 0 : i32
    return %arg0, %c0_i32 : i32, i32
  }
}

</mosaic_0001>

<bundles_post_ra>
// kernel: compatible_avg_pool2d.1
= control target key start
LH: loop header
LB: loop body
LE: loop exit
PB: predicated region body
PF: predicated region fallthrough
CT: control target
= control target key end

     0   :  { %vm14_vm0 = vcmask 7168   ;;  %s39_s0 = inlined_call_operand.vmem [shape: f32[8,256], index: 0, kind: input, shape index: {}]   ;;  %s40_s1 = inlined_call_operand.vmem [shape: f32[8,1], index: 1, kind: output, shape index: {}]  }
   0x1   :  { %v8_v0 = vld [vmem:[%s39_s0] sm:$0xff]  ;;  %v9_v1 = vld [vmem:[%s39_s0 + $0x8] sm:$0xff] }
   0x2   :  { %v10_v2 = vadd.f32 %v9_v1, %v8_v0 }
   0x4   :  { %11 = vadd.xlane.f32.xlu0 %v10_v2 }
  0x91   :  { %v12_v3 = vpop.xlane.xlu0 %11 }
  0x92   :  { %v13_v4 = vmul.f32 0.00390625, %v12_v3 }
  0x94   :  { %15 = vst.msk [vmem:[%s40_s1] sm:$0xff] %vm14_vm0, %v13_v4 }

</bundles_post_ra>
